<compile_context>
chip_gen: v7x
topology: tpu7x:2x2x1
jax: 0.10.0
libtpu: 0.0.40
codegen_flags: <defaults>
</compile_context>

<pallas_src>
import jax
import jax.numpy as jnp
from jax import lax
from jax.experimental import pallas as pl
from jax.experimental.pallas import tpu as pltpu


def _round_up(n: int, m: int) -> int:
    return ((n + m - 1) // m) * m


def local_mlp_kernel(x_ref, w_ref, s_ref, gamma_ref, beta_ref, o_ref):
    # x_ref:     (tm, Dp)  packed row tile (P logical rows of width D per lane-row)
    # w_ref:     (Dp, Dp)  block-diagonal replicated W^T (x_packed @ w == per-row x @ W.T)
    # s_ref:     (Dp, Dp)  segment-mean matrix: 1/D inside each DxD diagonal block (f32)
    # gamma_ref: (1, Dp)   f32 LayerNorm gamma, tiled P times along lanes
    # beta_ref:  (1, Dp)   f32 LayerNorm beta,  tiled P times along lanes
    # o_ref:     (tm, Dp)
    x = x_ref[...]                      # native dtype straight to the MXU
    w = w_ref[...]

    # Linear (MXU), f32 accumulation.
    y = jnp.dot(x, w, preferred_element_type=jnp.float32)

    # One-pass LayerNorm statistics via segment-mean matmuls (MXU, not XLU).
    s = s_ref[...]
    mean = jnp.dot(y, s, preferred_element_type=jnp.float32)          # E[y]   per segment
    mean_sq = jnp.dot(y * y, s, preferred_element_type=jnp.float32)   # E[y^2] per segment
    var = mean_sq - mean * mean

    y_hat = (y - mean) * lax.rsqrt(var + 1e-5)
    out = y_hat * gamma_ref[...] + beta_ref[...]

    # ReLU + lane-dense store.
    o_ref[...] = jnp.maximum(out, 0.0).astype(o_ref.dtype)


def local_mlp(x, w, gamma, beta, *, tm_max=512, lane_width=128):
    """LocalMLP forward: relu(LayerNorm(x @ w.T)).

    x:     (..., D)
    w:     (D, D)  torch-style Linear weight (no bias since use_norm=True)
    gamma: (D,)    LayerNorm weight
    beta:  (D,)    LayerNorm bias
    """
    D = x.shape[-1]
    orig_shape = x.shape
    x2 = x.reshape(-1, D)
    N = x2.shape[0]

    # Lane packing factor: pack P rows per 128-lane vreg row when D is narrow.
    if D < lane_width and lane_width % D == 0:
        P = lane_width // D
    else:
        P = 1
    Dp = P * D

    # torch Linear computes x @ W.T -> pre-transpose once in the wrapper.
    wt = jnp.transpose(w)
    if P > 1:
        w_bd = jnp.kron(jnp.eye(P, dtype=wt.dtype), wt)       # block-diagonal (Dp, Dp)
    else:
        w_bd = wt
    w_bd = w_bd.astype(x.dtype)                                # MXU-native operand dtype

    # Segment-mean matrix: 1/D in every DxD diagonal block (f32).
    seg = jnp.kron(jnp.eye(P, dtype=jnp.float32),
                   jnp.full((D, D), 1.0 / D, dtype=jnp.float32))

    gamma_p = jnp.tile(gamma.astype(jnp.float32).reshape(1, D), (1, P))
    beta_p = jnp.tile(beta.astype(jnp.float32).reshape(1, D), (1, P))

    # Pad rows so arbitrary leading shapes work, then pack P rows per lane-row.
    np_rows = -(-N // P)                               # packed rows (ceil)
    tm = min(tm_max, _round_up(np_rows, 16))           # big tile; mult of 16 (f32 & bf16 safe)
    np_pad = _round_up(np_rows, tm)
    n_pad = np_pad * P
    if n_pad != N:
        x2 = jnp.pad(x2, ((0, n_pad - N), (0, 0)))
    xp = x2.reshape(np_pad, Dp)

    out = pl.pallas_call(
        local_mlp_kernel,
        out_shape=jax.ShapeDtypeStruct((np_pad, Dp), x.dtype),
        grid_spec=pltpu.PrefetchScalarGridSpec(
            num_scalar_prefetch=0,
            grid=(np_pad // tm,),
            in_specs=[
                pl.BlockSpec((tm, Dp), lambda i: (i, 0)),    # packed row tile of x
                pl.BlockSpec((Dp, Dp), lambda i: (0, 0)),    # block-diag weight (resident)
                pl.BlockSpec((Dp, Dp), lambda i: (0, 0)),    # segment-mean matrix (resident)
                pl.BlockSpec((1, Dp), lambda i: (0, 0)),     # gamma (f32, pre-tiled)
                pl.BlockSpec((1, Dp), lambda i: (0, 0)),     # beta  (f32, pre-tiled)
            ],
            out_specs=pl.BlockSpec((tm, Dp), lambda i: (i, 0)),
        ),
        compiler_params=pltpu.CompilerParams(
            dimension_semantics=("parallel",),               # v7x: shard rows over 2 TCs
            vmem_limit_bytes=32 * 1024 * 1024,               # headroom, safe on v5e/v6e/v7x
        ),
    )(xp, w_bd, seg, gamma_p, beta_p)

    # Unpack lanes back to (N, D), drop row padding, restore leading dims.
    return out.reshape(np_pad * P, D)[:N].reshape(orig_shape)


def reference_local_mlp(x, w, gamma, beta):
    y = jnp.einsum("...d,ed->...e", x, w)  # torch Linear: x @ W.T
    mean = jnp.mean(y, axis=-1, keepdims=True)
    var = jnp.mean((y - mean) ** 2, axis=-1, keepdims=True)
    y = (y - mean) / jnp.sqrt(var + 1e-5)
    y = y * gamma + beta
    return jnp.maximum(y, 0.0)


if __name__ == "__main__":
    # Small shapes consistent with LocalMLP: x of shape (..., dim_in)
    batch, seq, dim_in = 2, 8, 32
    key = jax.random.PRNGKey(0)
    kx, kw, kg, kb = jax.random.split(key, 4)

    x = jax.random.normal(kx, (batch, seq, dim_in), dtype=jnp.float32)
    # Deterministic parameter init (Linear has no bias since use_norm=True)
    w = jax.random.normal(kw, (dim_in, dim_in), dtype=jnp.float32) * 0.1
    gamma = 1.0 + 0.01 * jax.random.normal(kg, (dim_in,), dtype=jnp.float32)
    beta = 0.01 * jax.random.normal(kb, (dim_in,), dtype=jnp.float32)

    out = local_mlp(x, w, gamma, beta)
    out = jax.block_until_ready(out)

    ref = reference_local_mlp(x, w, gamma, beta)
    assert out.shape == ref.shape == (batch, seq, dim_in)
    assert jnp.allclose(out, ref, atol=1e-4, rtol=1e-4), "mismatch vs reference"

    print("KERNEL_OK")
</pallas_src>

<mosaic_0001>
module attributes {stable_mosaic.version = 11 : i64} {
  func.func @local_mlp_kernel(%arg0: i32, %arg1: memref<16x128xf32, #tpu.memory_space<vmem>>, %arg2: memref<128x128xf32, #tpu.memory_space<vmem>>, %arg3: memref<128x128xf32, #tpu.memory_space<vmem>>, %arg4: memref<1x128xf32, #tpu.memory_space<vmem>>, %arg5: memref<1x128xf32, #tpu.memory_space<vmem>>, %arg6: memref<16x128xf32, #tpu.memory_space<vmem>>) attributes {dimension_semantics = [#tpu.dimension_semantics<parallel>], iteration_bounds = array<i64: 1>, scalar_prefetch = 0 : i64, scratch_operands = 0 : i64, tpu.core_type = #tpu.core_type<tc>, window_params = [{transform_indices = @transform_0, window_bounds = array<i64: 16, 128>}, {pipeline_mode = #tpu.pipeline_mode<synchronous>, transform_indices = @transform_1, window_bounds = array<i64: 128, 128>}, {pipeline_mode = #tpu.pipeline_mode<synchronous>, transform_indices = @transform_2, window_bounds = array<i64: 128, 128>}, {pipeline_mode = #tpu.pipeline_mode<synchronous>, transform_indices = @transform_3, window_bounds = array<i64: 1, 128>}, {pipeline_mode = #tpu.pipeline_mode<synchronous>, transform_indices = @transform_4, window_bounds = array<i64: 1, 128>}, {transform_indices = @transform_5, window_bounds = array<i64: 16, 128>}]} {
    %c0 = arith.constant 0 : index
    %c0_0 = arith.constant 0 : index
    %0 = vector.load %arg1[%c0, %c0_0] : memref<16x128xf32, #tpu.memory_space<vmem>>, vector<16x128xf32>
    %c0_1 = arith.constant 0 : index
    %c0_2 = arith.constant 0 : index
    %1 = vector.load %arg2[%c0_1, %c0_2] : memref<128x128xf32, #tpu.memory_space<vmem>>, vector<128x128xf32>
    %cst = arith.constant dense<0.000000e+00> : vector<16x128xf32>
    %2 = tpu.matmul %0, %1, %cst {dimension_numbers = #tpu.dot_dimension_numbers<[1], [0], [0], [1], [0, 0, 1, 1], [], []>} : vector<16x128xf32>, vector<128x128xf32>, vector<16x128xf32> -> vector<16x128xf32>
    %c0_3 = arith.constant 0 : index
    %c0_4 = arith.constant 0 : index
    %3 = vector.load %arg3[%c0_3, %c0_4] : memref<128x128xf32, #tpu.memory_space<vmem>>, vector<128x128xf32>
    %cst_5 = arith.constant dense<0.000000e+00> : vector<16x128xf32>
    %4 = tpu.matmul %2, %3, %cst_5 {dimension_numbers = #tpu.dot_dimension_numbers<[1], [0], [0], [1], [0, 0, 1, 1], [], []>} : vector<16x128xf32>, vector<128x128xf32>, vector<16x128xf32> -> vector<16x128xf32>
    %5 = arith.mulf %2, %2 : vector<16x128xf32>
    %cst_6 = arith.constant dense<0.000000e+00> : vector<16x128xf32>
    %6 = tpu.matmul %5, %3, %cst_6 {dimension_numbers = #tpu.dot_dimension_numbers<[1], [0], [0], [1], [0, 0, 1, 1], [], []>} : vector<16x128xf32>, vector<128x128xf32>, vector<16x128xf32> -> vector<16x128xf32>
    %7 = arith.mulf %4, %4 : vector<16x128xf32>
    %8 = arith.subf %6, %7 : vector<16x128xf32>
    %9 = arith.subf %2, %4 : vector<16x128xf32>
    %cst_7 = arith.constant 9.99999974E-6 : f32
    %10 = vector.broadcast %cst_7 : f32 to vector<16x128xf32>
    %11 = arith.addf %8, %10 : vector<16x128xf32>
    %12 = math.rsqrt %11 : vector<16x128xf32>
    %13 = arith.mulf %9, %12 : vector<16x128xf32>
    %c0_8 = arith.constant 0 : index
    %c0_9 = arith.constant 0 : index
    %14 = vector.load %arg4[%c0_8, %c0_9] : memref<1x128xf32, #tpu.memory_space<vmem>>, vector<1x128xf32>
    %15 = vector.broadcast %14 : vector<1x128xf32> to vector<16x128xf32>
    %16 = arith.mulf %13, %15 : vector<16x128xf32>
    %c0_10 = arith.constant 0 : index
    %c0_11 = arith.constant 0 : index
    %17 = vector.load %arg5[%c0_10, %c0_11] : memref<1x128xf32, #tpu.memory_space<vmem>>, vector<1x128xf32>
    %18 = vector.broadcast %17 : vector<1x128xf32> to vector<16x128xf32>
    %19 = arith.addf %16, %18 : vector<16x128xf32>
    %cst_12 = arith.constant 0.000000e+00 : f32
    %20 = vector.broadcast %cst_12 : f32 to vector<16x128xf32>
    %21 = arith.maximumf %19, %20 : vector<16x128xf32>
    %c0_13 = arith.constant 0 : index
    %c0_14 = arith.constant 0 : index
    %22 = vector.load %arg6[%c0_13, %c0_14] : memref<16x128xf32, #tpu.memory_space<vmem>>, vector<16x128xf32>
    tpu.vector_store %arg6[%c0_13, %c0_14], %21 {strides = array<i32>} : memref<16x128xf32, #tpu.memory_space<vmem>>, vector<16x128xf32>,
    return
  }
  func.func @transform_0(%arg0: i32) -> (i32, i32) {
    %c0_i32 = arith.constant 0 : i32
    %c0_i32_0 = arith.constant 0 : i32
    return %arg0, %c0_i32 : i32, i32
  }
  func.func @transform_1(%arg0: i32) -> (i32, i32) {
    %c0_i32 = arith.constant 0 : i32
    %c0_i32_0 = arith.constant 0 : i32
    %c0_i32_1 = arith.constant 0 : i32
    return %c0_i32, %c0_i32_0 : i32, i32
  }
  func.func @transform_2(%arg0: i32) -> (i32, i32) {
    %c0_i32 = arith.constant 0 : i32
    %c0_i32_0 = arith.constant 0 : i32
    %c0_i32_1 = arith.constant 0 : i32
    return %c0_i32, %c0_i32_0 : i32, i32
  }
  func.func @transform_3(%arg0: i32) -> (i32, i32) {
    %c0_i32 = arith.constant 0 : i32
    %c0_i32_0 = arith.constant 0 : i32
    %c0_i32_1 = arith.constant 0 : i32
    return %c0_i32, %c0_i32_0 : i32, i32
  }
  func.func @transform_4(%arg0: i32) -> (i32, i32) {
    %c0_i32 = arith.constant 0 : i32
    %c0_i32_0 = arith.constant 0 : i32
    %c0_i32_1 = arith.constant 0 : i32
    return %c0_i32, %c0_i32_0 : i32, i32
  }
  func.func @transform_5(%arg0: i32) -> (i32, i32) {
    %c0_i32 = arith.constant 0 : i32
    %c0_i32_0 = arith.constant 0 : i32
    return %arg0, %c0_i32 : i32, i32
  }
}

</mosaic_0001>

<bundles_post_ra>
// kernel: tpu_custom_call.1
= control target key start
LH: loop header
LB: loop body
LE: loop exit
PB: predicated region body
PF: predicated region fallthrough
CT: control target
= control target key end

     0   :  { %10 = vsyncpa [#allocation3], 0  ;;  %s857_s0 = inlined_call_operand.hbm [shape: f32[16,128], index: 0, kind: input, shape index: {}]   ;;  %s858_s1 = inlined_call_operand.hbm [shape: f32[128,128], index: 1, kind: input, shape index: {}]   ;;  %s859_s2 = inlined_call_operand.hbm [shape: f32[128,128], index: 2, kind: input, shape index: {}]   ;;  %s860_s3 = inlined_call_operand.vmem [shape: f32[1,128], index: 3, kind: input, shape index: {}]   ;;  %s861_s4 = inlined_call_operand.vmem [shape: f32[1,128], index: 4, kind: input, shape index: {}]   ;;  %s862_s5 = inlined_call_operand.hbm [shape: f32[16,128], index: 5, kind: output, shape index: {}]  }
   0x1   :  { %11 = vsyncpa [#allocation6], 0 }
   0x2   :  { %12 = vsyncpa [#allocation4], 0  ;;  %s736_s18 = smov [#allocation5]   ;;  %s737_s20 = smov [#allocation2]  }
   0x3   :  { %s30_s19 = sshll.u32 %s736_s18, 4  ;;  %s18_s21 = sshll.u32 %s737_s20, 4  ;;  %s31_s19 = int_to_ptr.vmem [resolvable:$true] %s30_s19  ;;  %s772_s21 = int_to_ptr.vmem [resolvable:$true] %s18_s21 }
   0x4   :  { %s642_s24 = scalar_lea.hbm %s858_s1, 2048 }
   0x5   :  { %p643_p0 = scmp.ne.s32.totalorder %s858_s1, %s642_s24  ;;  %p646_p1 = scmp.lt.u32.totalorder %s642_s24, %s858_s1 }
   0x7   :  { %p648_p2 = pnand %p646_p1, %p643_p0 }
   0x9   :  { %651 = shalt.err (!%p648_p2)
}
   0xa   :  { %s652_s29 = scalar_lea.vmem %s31_s19, 2048  ;;  %p657_p4 = scmp.lt.s32.totalorder %s31_s19, %s31_s19 }
   0xb   :  { %p653_p3 = scmp.ne.s32.totalorder %s31_s19, %s652_s29  ;;  %p658_p5 = scmp.lt.s32.totalorder %s652_s29, %s652_s29 }
   0xd   :  { %p659_p6 = por %p658_p5, %p657_p4 }
   0xf   :  { %p660_p7 = pnand %p659_p6, %p653_p3 }
  0x11   :  { %663 = shalt.err (!%p660_p7)
}
  0x12   :  { %s738_s30 = smov 128   ;;  %s739_s6 = smov 8  }
  0x13   :  { %36 = dma.hbm_to_vmem [thread:$0]  %s858_s1, 2048, %s31_s19, [#allocation6], %s738_s30, %s738_s30, %s739_s6  }
  0x14   :  { %s664_s11 = scalar_lea.hbm %s857_s0, 256 }
  0x15   :  { %p665_p8 = scmp.ne.s32.totalorder %s857_s0, %s664_s11  ;;  %p668_p9 = scmp.lt.u32.totalorder %s664_s11, %s857_s0 }
  0x17   :  { %p670_p10 = pnand %p668_p9, %p665_p8 }
  0x19   :  { %673 = shalt.err (!%p670_p10)
}
  0x1a   :  { %s674_s16 = scalar_lea.vmem %s772_s21, 256  ;;  %p679_p12 = scmp.lt.s32.totalorder %s772_s21, %s772_s21 }
  0x1b   :  { %p675_p11 = scmp.ne.s32.totalorder %s772_s21, %s674_s16  ;;  %p680_p13 = scmp.lt.s32.totalorder %s674_s16, %s674_s16 }
  0x1d   :  { %p681_p0 = por %p680_p13, %p679_p12 }
  0x1f   :  { %p682_p1 = pnand %p681_p0, %p675_p11 }
  0x21   :  { %685 = shalt.err (!%p682_p1)
}
  0x22   :  { %24 = dma.hbm_to_vmem [thread:$0]  %s857_s0, 256, %s772_s21, [#allocation3], %s738_s30, %s738_s30, %s739_s6  }
  0x23   :  { %s740_s18 = smov [#allocation7]   ;;  %s686_s23 = scalar_lea.hbm %s859_s2, 2048 }
  0x24   :  { %s42_s19 = sshll.u32 %s740_s18, 4  ;;  %p687_p2 = scmp.ne.s32.totalorder %s859_s2, %s686_s23  ;;  %s43_s19 = int_to_ptr.vmem [resolvable:$true] %s42_s19 }
  0x25   :  { %p690_p3 = scmp.lt.u32.totalorder %s686_s23, %s859_s2 }
  0x27   :  { %p692_p4 = pnand %p690_p3, %p687_p2 }
  0x29   :  { %695 = shalt.err (!%p692_p4)
}
  0x2a   :  { %s696_s28 = scalar_lea.vmem %s43_s19, 2048  ;;  %p701_p6 = scmp.lt.s32.totalorder %s43_s19, %s43_s19 }
  0x2b   :  { %p697_p5 = scmp.ne.s32.totalorder %s43_s19, %s696_s28  ;;  %p702_p7 = scmp.lt.s32.totalorder %s696_s28, %s696_s28 }
  0x2d   :  { %p703_p8 = por %p702_p7, %p701_p6 }
  0x2f   :  { %p704_p9 = pnand %p703_p8, %p697_p5 }
  0x31   :  { %707 = shalt.err (!%p704_p9)
}
  0x32   :  { %48 = dma.hbm_to_vmem [thread:$0]  %s859_s2, 2048, %s43_s19, [#allocation6], %s738_s30, %s738_s30, %s739_s6  }
  0x33   :  { %730 = dma.done.wait [#allocation3], 256  }
  0x34   :  { %731 = vsyncadd [#allocation3], 4294967040 }
  0x35   :  { %732 = dma.done.wait [#allocation6], 4096  }
  0x36   :  { %733 = vsyncadd [#allocation6], 4294963200  ;;  %v64_v0 = vld [vmem:[#allocation5] sm:$0xff]  ;;  %v65_v1 = vld [vmem:[#allocation5 + $0x8] sm:$0xff]  ;;  %s741_s9 = smov [#allocation8]  }
  0x37   :  { %v66_v2 = vld [vmem:[#allocation5 + $0x10] sm:$0xff]  ;;  %v536_v3 = vpack.c.bf16 %v65_v1, %v64_v0  ;;  %v67_v4 = vld [vmem:[#allocation5 + $0x18] sm:$0xff]  ;;  %v68_v6 = vld [vmem:[#allocation5 + $0x20] sm:$0xff]  ;;  %s362_s10 = sshll.u32 %s741_s9, 4  ;;  %s363_s10 = int_to_ptr.vmem [resolvable:$true] %s362_s10 }
  0x38   :  { %v540_v5 = vpack.c.bf16 %v67_v4, %v66_v2  ;;  %v69_v7 = vld [vmem:[#allocation5 + $0x28] sm:$0xff]  ;;  %v70_v9 = vld [vmem:[#allocation5 + $0x30] sm:$0xff]  ;;  %v71_v10 = vld [vmem:[#allocation5 + $0x38] sm:$0xff]  ;;  %s708_s11 = scalar_lea.vmem %s363_s10, 256  ;;  %p713_p11 = scmp.lt.s32.totalorder %s363_s10, %s363_s10 }
  0x39   :  { %537 = vmatprep.subr.bf16.mxu0 %v536_v3  ;;  %v544_v8 = vpack.c.bf16 %v69_v7, %v68_v6  ;;  %v62_v11 = vld [vmem:[#allocation2] sm:$0xff]  ;;  %v155_v12 = vld [vmem:[#allocation7] sm:$0xff]  ;;  %v156_v13 = vld [vmem:[#allocation7 + $0x8] sm:$0xff]  ;;  %v548_v20 = vpack.c.bf16 %v71_v10, %v70_v9  ;;  %p709_p10 = scmp.ne.s32.totalorder %s363_s10, %s708_s11  ;;  %p714_p12 = scmp.lt.s32.totalorder %s708_s11, %s708_s11 }
  0x3a   :  { %539 = vmatpush3.bf16.msra.mxu0 %v536_v3  ;;  %463 = vmatprep.mubr.f32.mxu0 %v62_v11  ;;  %v157_v14 = vld [vmem:[#allocation7 + $0x10] sm:$0xff]  ;;  %v824_v15 = vpack.c.bf16 %v156_v13, %v155_v12  ;;  %v158_v16 = vld [vmem:[#allocation7 + $0x18] sm:$0xff]  ;;  %v159_v18 = vld [vmem:[#allocation7 + $0x20] sm:$0xff] }
  0x3b   :  { %541 = vmatprep.subr.bf16.mxu0 %v540_v5  ;;  %v826_v17 = vpack.c.bf16 %v158_v16, %v157_v14  ;;  %v160_v19 = vld [vmem:[#allocation7 + $0x28] sm:$0xff]  ;;  %v72_v21 = vld [vmem:[#allocation5 + $0x40] sm:$0xff]  ;;  %v161_v24 = vld [vmem:[#allocation7 + $0x30] sm:$0xff]  ;;  %p715_p13 = por %p714_p12, %p713_p11 }
  0x3c   :  { %569 = vmatprep.subr.bf16.mxu1 %v824_v15  ;;  %v73_v22 = vld [vmem:[#allocation5 + $0x48] sm:$0xff]  ;;  %v576_v23 = vpack.c.bf16 %v160_v19, %v159_v18  ;;  %v162_v25 = vld [vmem:[#allocation7 + $0x38] sm:$0xff]  ;;  %v74_v27 = vld [vmem:[#allocation5 + $0x50] sm:$0xff] }
  0x3d   :  { %571 = vmatpush3.bf16.msra.mxu1 %v824_v15  ;;  %v552_v26 = vpack.c.bf16 %v73_v22, %v72_v21  ;;  %v75_v28 = vld [vmem:[#allocation5 + $0x58] sm:$0xff]  ;;  %v580_v29 = vpack.c.bf16 %v162_v25, %v161_v24  ;;  %v163_v30 = vld [vmem:[#allocation7 + $0x40] sm:$0xff]  ;;  %v164_v31 = vld [vmem:[#allocation7 + $0x48] sm:$0xff]  ;;  %p716_p0 = pnand %p715_p13, %p709_p10 }
  0x3e   :  { %543 = vmatpush3.bf16.msra.mxu0 %v540_v5  ;;  %573 = vmatprep.subr.bf16.mxu1 %v826_v17  ;;  %v556_v32 = vpack.c.bf16 %v75_v28, %v74_v27  ;;  %v76_v33 = vld [vmem:[#allocation5 + $0x60] sm:$0xff]  ;;  %v77_v34 = vld [vmem:[#allocation5 + $0x68] sm:$0xff]  ;;  %v584_v35 = vpack.c.bf16 %v164_v31, %v163_v30  ;;  %v165_v36 = vld [vmem:[#allocation7 + $0x50] sm:$0xff] }
  0x3f   :  { %545 = vmatprep.subr.bf16.mxu0 %v544_v8  ;;  %v166_v37 = vld [vmem:[#allocation7 + $0x58] sm:$0xff]  ;;  %v560_v38 = vpack.c.bf16 %v77_v34, %v76_v33  ;;  %v78_v39 = vld [vmem:[#allocation5 + $0x70] sm:$0xff]  ;;  %v167_v42 = vld [vmem:[#allocation7 + $0x60] sm:$0xff] }
  0x40   :  { %v79_v40 = vld [vmem:[#allocation5 + $0x78] sm:$0xff]  ;;  %v588_v41 = vpack.c.bf16 %v166_v37, %v165_v36  ;;  %v168_v43 = vld [vmem:[#allocation7 + $0x68] sm:$0xff]  ;;  %v169_v46 = vld [vmem:[#allocation7 + $0x70] sm:$0xff] }
  0x41   :  { %575 = vmatpush3.bf16.msra.mxu1 %v826_v17  ;;  %v564_v44 = vpack.c.bf16 %v79_v40, %v78_v39  ;;  %v592_v45 = vpack.c.bf16 %v168_v43, %v167_v42  ;;  %v170_v47 = vld [vmem:[#allocation7 + $0x78] sm:$0xff]  ;;  %v375_v3 = vld [vmem:[%s860_s3] ss:$0 sm:$0xff] }
  0x42   :  { %547 = vmatpush3.bf16.msra.mxu0 %v544_v8  ;;  %577 = vmatprep.subr.bf16.mxu1 %v576_v23  ;;  %v596_v48 = vpack.c.bf16 %v170_v47, %v169_v46  ;;  %v63_v49 = vld [vmem:[#allocation2 + $0x8] sm:$0xff]  ;;  %v376_v7 = vld [vmem:[%s861_s4] ss:$0 sm:$0xff] }
  0x43   :  { %549 = vmatprep.subr.bf16.mxu0 %v548_v20 }
  0x45   :  { %579 = vmatpush3.bf16.msra.mxu1 %v576_v23 }
  0x46   :  { %551 = vmatpush3.bf16.msra.mxu0 %v548_v20  ;;  %581 = vmatprep.subr.bf16.mxu1 %v580_v29 }
  0x47   :  { %553 = vmatprep.subr.bf16.mxu0 %v552_v26 }
  0x49   :  { %583 = vmatpush3.bf16.msra.mxu1 %v580_v29 }
  0x4a   :  { %555 = vmatpush3.bf16.msra.mxu0 %v552_v26  ;;  %585 = vmatprep.subr.bf16.mxu1 %v584_v35 }
  0x4b   :  { %557 = vmatprep.subr.bf16.mxu0 %v556_v32 }
  0x4d   :  { %587 = vmatpush3.bf16.msra.mxu1 %v584_v35 }
  0x4e   :  { %559 = vmatpush3.bf16.msra.mxu0 %v556_v32  ;;  %589 = vmatprep.subr.bf16.mxu1 %v588_v41 }
  0x4f   :  { %561 = vmatprep.subr.bf16.mxu0 %v560_v38 }
  0x51   :  { %591 = vmatpush3.bf16.msra.mxu1 %v588_v41 }
  0x52   :  { %563 = vmatpush3.bf16.msra.mxu0 %v560_v38  ;;  %593 = vmatprep.subr.bf16.mxu1 %v592_v45 }
  0x53   :  { %565 = vmatprep.subr.bf16.mxu0 %v564_v44 }
  0x55   :  { %595 = vmatpush3.bf16.msra.mxu1 %v592_v45 }
  0x56   :  { %567 = vmatpush3.bf16.msra.mxu0 %v564_v44  ;;  %597 = vmatprep.subr.bf16.mxu1 %v596_v48 }
  0x57   :  { %601 = vmatprep.subr.bf16.mxu0 %v824_v15 }
  0x59   :  { %464 = vmatmul.mubr.f32.vlgmr.msra.gmra.mrb[0].mxu0 %v63_v49  ;;  %599 = vmatpush3.bf16.msra.mxu1 %v596_v48 }
  0x5a   :  { %603 = vmatpush3.bf16.msra.mxu0 %v824_v15 }
  0x5b   :  { %605 = vmatprep.subr.bf16.mxu0 %v826_v17 }
  0x5e   :  { %607 = vmatpush3.bf16.msra.mxu0 %v826_v17 }
  0x5f   :  { %609 = vmatprep.subr.bf16.mxu0 %v576_v23 }
  0x62   :  { %611 = vmatpush3.bf16.msra.mxu0 %v576_v23 }
  0x63   :  { %613 = vmatprep.subr.bf16.mxu0 %v580_v29 }
  0x66   :  { %615 = vmatpush3.bf16.msra.mxu0 %v580_v29 }
  0x67   :  { %617 = vmatprep.subr.bf16.mxu0 %v584_v35 }
  0x6a   :  { %619 = vmatpush3.bf16.msra.mxu0 %v584_v35 }
  0x6b   :  { %621 = vmatprep.subr.bf16.mxu0 %v588_v41 }
  0x6e   :  { %623 = vmatpush3.bf16.msra.mxu0 %v588_v41 }
  0x6f   :  { %625 = vmatprep.subr.bf16.mxu0 %v592_v45 }
  0x72   :  { %627 = vmatpush3.bf16.msra.mxu0 %v592_v45 }
  0x73   :  { %629 = vmatprep.subr.bf16.mxu0 %v596_v48 }
  0x76   :  { %631 = vmatpush3.bf16.msra.mxu0 %v596_v48 }
 0x12c   :  { %v465_v50 = vpop.f32.mrb[0].mxu0 }
 0x12d   :  { %v146_v51 = vpop.f32.mrb[1].mxu0  ;;  %v247_v53 = vmul.f32 %v465_v50, %v465_v50 }
 0x12e   :  { %v246_v52 = vmul.f32 %v146_v51, %v146_v51  ;;  %498 = vmatprep.mubr.f32.mxu1 %v146_v51 }
 0x12f   :  { %499 = vmatmul.mubr.f32.vlgmr.msra.gmra.mrb[0].mxu1 %v465_v50 }
 0x130   :  { %533 = vmatprep.mubr.f32.mxu0 %v246_v52 }
 0x131   :  { %534 = vmatmul.mubr.f32.vlgmr.msra.gmra.mrb[2].mxu0 %v247_v53 }
 0x202   :  { %v500_v54 = vpop.f32.mrb[0].mxu1 }
 0x203   :  { %v324_v55 = vmul.f32 %v500_v54, %v500_v54  ;;  %v328_v56 = vsub.f32 %v465_v50, %v500_v54  ;;  %v237_v57 = vpop.f32.mrb[1].mxu1 }
 0x204   :  { %v323_v58 = vmul.f32 %v237_v57, %v237_v57  ;;  %v327_v59 = vsub.f32 %v146_v51, %v237_v57  ;;  %v535_v60 = vpop.f32.mrb[2].mxu0 }
 0x205   :  { %v326_v61 = vsub.f32 %v535_v60, %v324_v55  ;;  %v314_v62 = vpop.f32.mrb[3].mxu0 }
 0x206   :  { %v325_v63 = vsub.f32 %v314_v62, %v323_v58 }
 0x207   :  { %v330_v0 = vadd.f32 1e-05, %v326_v61 }
 0x208   :  { %v329_v1 = vadd.f32 1e-05, %v325_v63 }
 0x209   :  { %638 = vrsqrt.f32 %v330_v0 }
 0x20a   :  { %640 = vrsqrt.f32 %v329_v1 }
 0x213   :  { %v639_v2 = vpop.eup %638 }
 0x214   :  { %v641_v4 = vpop.eup %640  ;;  %v334_v5 = vmul.f32 %v639_v2, %v328_v56 }
 0x215   :  { %v333_v6 = vmul.f32 %v641_v4, %v327_v59 }
 0x216   :  { %v343_v8 = vmul.f32 %v375_v3, %v334_v5 }
 0x217   :  { %v342_v9 = vmul.f32 %v375_v3, %v333_v6 }
 0x218   :  { %v352_v10 = vadd.f32 %v376_v7, %v343_v8 }
 0x219   :  { %v351_v11 = vadd.f32 %v376_v7, %v342_v9 }
 0x21a   :  { %v354_v12 = vmax.f32 %v352_v10, 0.0 }
 0x21b   :  { %v353_v13 = vmax.f32 %v351_v11, 0.0 }
 0x21c   :  { %356 = vst [vmem:[#allocation8 + $0x8] sm:$0xff] %v354_v12 }
 0x21d   :  { %355 = vst [vmem:[#allocation8] sm:$0xff] %v353_v13 }
 0x21e   :  { %719 = shalt.err (!%p716_p0)
}
 0x21f   :  { %s720_s12 = scalar_lea.hbm %s862_s5, 256 }
 0x220   :  { %p721_p1 = scmp.ne.s32.totalorder %s862_s5, %s720_s12  ;;  %p724_p2 = scmp.lt.u32.totalorder %s720_s12, %s862_s5 }
 0x222   :  { %p726_p3 = pnand %p724_p2, %p721_p1 }
 0x224   :  { %729 = shalt.err (!%p726_p3)
}
 0x225   :  { %368 = dma.vmem_to_hbm [thread:$0]  %s363_s10, 256, %s862_s5, [#allocation4], %s738_s30, %s738_s30, %s739_s6  }
 0x226   :  { %734 = dma.done.wait [#allocation4], 256  }
 0x227   :  { %735 = vsyncadd [#allocation4], 4294967040 }
 0x228   :  { %372 = vsyncpa [#allocation3], 1 }
 0x229   :  { %373 = vsyncpa [#allocation6], 1 }
 0x22a   :  { %374 = vsyncpa [#allocation4], 1 }

</bundles_post_ra>
